<compile_context>
chip_gen: v5e
topology: v5e:2x2
jax: 0.10.0
libtpu: 0.0.40
codegen_flags: <defaults>
</compile_context>

<pallas_src>
import jax
import jax.numpy as jnp
from jax.experimental import pallas as pl
from jax.experimental.pallas import tpu as pltpu


def _round_up(x, m):
    return (x + m - 1) // m * m


def _user_encoder_kernel(len_ref, x_ref, w1_ref, b1_ref, v_ref, out_ref):
    # len_ref: (BT, 1)   int32   per-user real history length (0 for pad users)
    # x_ref:   (BT, L, D) bf16   encoded + padded histories for BT users
    # w1_ref:  (D, H)    bf16    attention projection weight (VMEM-resident)
    # b1_ref:  (1, H)    f32     attention projection bias
    # v_ref:   (1, H)    f32     attention query vector (as a lane-dense row)
    # out_ref: (BT, D)   f32     user embeddings
    BT, L, D = x_ref.shape

    x = x_ref[...]                                   # (BT, L, D) bf16

    # One big MXU matmul over all BT*L history rows in the block.
    # L is padded to a multiple of 8 in the wrapper, so this collapse of the
    # leading dims is layout-trivial (no relayout copy).
    x2 = x.reshape(BT * L, D)
    h = jnp.tanh(
        jnp.dot(x2, w1_ref[...], preferred_element_type=jnp.float32)
        + b1_ref[...]
    )                                                # (BT*L, H) f32

    # scores = h @ v, done as VPU multiply + lane reduce (avoids an N=1 MXU
    # matvec that would burn a full MXU pass for one output lane).
    scores = jnp.sum(h * v_ref[...], axis=-1, keepdims=True)   # (BT*L, 1) f32
    scores = scores.reshape(BT, L, 1)                          # per-user view

    # Build the sequence mask in-kernel from the per-user lengths.
    lens = len_ref[...]                               # (BT, 1) int32
    pos = jax.lax.broadcasted_iota(jnp.int32, (BT, L, 1), 1)
    scores = jnp.where(pos < lens[:, :, None], scores, -1e9)

    # Masked softmax over the (padded) history axis, all in f32.
    s_max = jnp.max(scores, axis=1, keepdims=True)    # (BT, 1, 1)
    e = jnp.exp(scores - s_max)                       # (BT, L, 1)
    denom = jnp.sum(e, axis=1, keepdims=True)         # (BT, 1, 1)
    weights = e * pl.reciprocal(denom, approx=False)  # (BT, L, 1)

    # TODO(synk): Dropout(p=0.2) on the attention weights is identity in eval
    # mode; training-mode stochastic dropout (pltpu.prng_random_bits) omitted.

    # Weighted sum over the history axis -> lane/sublane-dense (BT, D) store.
    out_ref[...] = jnp.sum(
        x.astype(jnp.float32) * weights, axis=1
    ).astype(out_ref.dtype)


def naml_user_encoder(encoded_histories, n_articles, w1, b1, v, *, block_users=None):
    """encoded_histories: (B, L, D) float (already padded to max_history_length)
       n_articles:        (B,) int32 per-user real history length
       w1: (D, H), b1: (H,), v: (H,)
       returns user embeddings (B, D) float32."""
    B, L, D = encoded_histories.shape
    H = w1.shape[1]

    # Pad the history axis to a sublane multiple so the in-kernel
    # (BT, L, D) -> (BT*L, D) collapse is layout-trivial. Padded rows are
    # masked out via n_articles (and are zero anyway).
    Lp = _round_up(L, 8)
    # Pad the attention hidden dim to a lane multiple: padded columns of W1/b1/v
    # are zero, contribute tanh(0)*0 = 0 to the scores.
    Hp = _round_up(H, 128)

    # Batch tile: target ~512 history rows of x per grid step (memory-bound
    # sweet spot), keep BT a multiple of 8 for sublane-dense outputs.
    if block_users is None:
        block_users = max(8, 512 // Lp)
    block_users = _round_up(min(block_users, _round_up(B, 8)), 8)
    Bp = _round_up(B, block_users)
    BT = block_users

    # bf16 activations/weights for HBM traffic; f32 bias/query/outputs.
    x = jnp.zeros((Bp, Lp, D), jnp.bfloat16).at[:B, :L, :].set(
        encoded_histories.astype(jnp.bfloat16))
    lens = jnp.zeros((Bp, 1), jnp.int32).at[:B, 0].set(n_articles.astype(jnp.int32))
    w1p = jnp.zeros((D, Hp), jnp.bfloat16).at[:, :H].set(w1.astype(jnp.bfloat16))
    b1p = jnp.zeros((1, Hp), jnp.float32).at[0, :H].set(b1.astype(jnp.float32))
    vp = jnp.zeros((1, Hp), jnp.float32).at[0, :H].set(v.astype(jnp.float32))

    grid_spec = pltpu.PrefetchScalarGridSpec(
        num_scalar_prefetch=0,
        grid=(Bp // BT,),
        in_specs=[
            pl.BlockSpec((BT, 1), lambda i: (i, 0)),          # per-user lengths
            pl.BlockSpec((BT, Lp, D), lambda i: (i, 0, 0)),   # histories (bf16)
            pl.BlockSpec((D, Hp), lambda i: (0, 0)),          # W1 (resident)
            pl.BlockSpec((1, Hp), lambda i: (0, 0)),          # b1
            pl.BlockSpec((1, Hp), lambda i: (0, 0)),          # v
        ],
        out_specs=pl.BlockSpec((BT, D), lambda i: (i, 0)),
    )

    out = pl.pallas_call(
        _user_encoder_kernel,
        out_shape=jax.ShapeDtypeStruct((Bp, D), jnp.float32),
        grid_spec=grid_spec,
        compiler_params=pltpu.CompilerParams(
            dimension_semantics=("parallel",),
        ),
    )(lens, x, w1p, b1p, vp)
    return out[:B]


def _reference(encoded_histories, n_articles, w1, b1, v):
    # Reference on the same bf16-rounded x/W1 the kernel streams, math in f32.
    x = encoded_histories.astype(jnp.bfloat16).astype(jnp.float32)
    w1f = w1.astype(jnp.bfloat16).astype(jnp.float32)
    B, L, D = x.shape
    mask = jnp.arange(L)[None, :] < n_articles[:, None]
    h = jnp.tanh(x @ w1f + b1)                        # (B, L, H)
    scores = h @ v                                    # (B, L)
    scores = jnp.where(mask, scores, -1e9)
    weights = jax.nn.softmax(scores, axis=-1)         # (B, L)
    return jnp.sum(x * weights[..., None], axis=1)    # (B, D)


if __name__ == "__main__":
    # Small shapes consistent with the module's forward
    # (embedding_dim D, attn_hidden_dim H, max_history_length L, batch B).
    B, L, D, H = 16, 8, 128, 128

    key = jax.random.PRNGKey(0)
    k_hist, k_len, k_w1, k_b1, k_v = jax.random.split(key, 5)

    # Simulated news_encoder output per history, already padded to L.
    encoded_histories = jax.random.normal(k_hist, (B, L, D), dtype=jnp.float32)
    n_articles = jax.random.randint(k_len, (B,), 1, L + 1).astype(jnp.int32)
    # Zero out padded slots, as _pad_history does.
    pad_mask = (jnp.arange(L)[None, :] < n_articles[:, None]).astype(jnp.float32)
    encoded_histories = encoded_histories * pad_mask[..., None]

    # Deterministic AttentionLayer parameters (Linear(D->H) + query vector H).
    w1 = jax.random.normal(k_w1, (D, H), dtype=jnp.float32) * (1.0 / jnp.sqrt(D))
    b1 = jax.random.normal(k_b1, (H,), dtype=jnp.float32) * 0.01
    v = jax.random.normal(k_v, (H,), dtype=jnp.float32) * (1.0 / jnp.sqrt(H))

    # block_users=8 -> grid of 2 parallel steps for this small demo.
    out = naml_user_encoder(encoded_histories, n_articles, w1, b1, v, block_users=8)
    out = jax.block_until_ready(out)

    ref = _reference(encoded_histories, n_articles, w1, b1, v)
    assert out.shape == (B, D)
    max_err = jnp.max(jnp.abs(out - ref))
    assert jnp.allclose(out, ref, atol=2e-3, rtol=2e-3), f"mismatch vs reference (max abs err {max_err})"

    print("KERNEL_OK")
</pallas_src>

<mosaic_0001>
module attributes {stable_mosaic.version = 11 : i64} {
  func.func @_user_encoder_kernel(%arg0: i32, %arg1: memref<8x1xi32, #tpu.memory_space<vmem>>, %arg2: memref<8x8x128xbf16, #tpu.memory_space<vmem>>, %arg3: memref<128x128xbf16, #tpu.memory_space<vmem>>, %arg4: memref<1x128xf32, #tpu.memory_space<vmem>>, %arg5: memref<1x128xf32, #tpu.memory_space<vmem>>, %arg6: memref<8x128xf32, #tpu.memory_space<vmem>>) attributes {dimension_semantics = [#tpu.dimension_semantics<parallel>], iteration_bounds = array<i64: 2>, scalar_prefetch = 0 : i64, scratch_operands = 0 : i64, tpu.core_type = #tpu.core_type<tc>, window_params = [{transform_indices = @transform_0, window_bounds = array<i64: 8, 1>}, {transform_indices = @transform_1, window_bounds = array<i64: 8, 8, 128>}, {pipeline_mode = #tpu.pipeline_mode<synchronous>, transform_indices = @transform_2, window_bounds = array<i64: 128, 128>}, {pipeline_mode = #tpu.pipeline_mode<synchronous>, transform_indices = @transform_3, window_bounds = array<i64: 1, 128>}, {pipeline_mode = #tpu.pipeline_mode<synchronous>, transform_indices = @transform_4, window_bounds = array<i64: 1, 128>}, {transform_indices = @transform_5, window_bounds = array<i64: 8, 128>}]} {
    %c0 = arith.constant 0 : index
    %c0_0 = arith.constant 0 : index
    %c0_1 = arith.constant 0 : index
    %0 = vector.load %arg2[%c0, %c0_0, %c0_1] : memref<8x8x128xbf16, #tpu.memory_space<vmem>>, vector<8x8x128xbf16>
    %1 = vector.shape_cast %0 : vector<8x8x128xbf16> to vector<64x128xbf16>
    %c0_2 = arith.constant 0 : index
    %c0_3 = arith.constant 0 : index
    %2 = vector.load %arg3[%c0_2, %c0_3] : memref<128x128xbf16, #tpu.memory_space<vmem>>, vector<128x128xbf16>
    %cst = arith.constant dense<0.000000e+00> : vector<64x128xf32>
    %3 = tpu.matmul %1, %2, %cst {dimension_numbers = #tpu.dot_dimension_numbers<[1], [0], [0], [1], [0, 0, 1, 1], [], []>} : vector<64x128xbf16>, vector<128x128xbf16>, vector<64x128xf32> -> vector<64x128xf32>
    %c0_4 = arith.constant 0 : index
    %c0_5 = arith.constant 0 : index
    %4 = vector.load %arg4[%c0_4, %c0_5] : memref<1x128xf32, #tpu.memory_space<vmem>>, vector<1x128xf32>
    %5 = vector.broadcast %4 : vector<1x128xf32> to vector<64x128xf32>
    %6 = arith.addf %3, %5 : vector<64x128xf32>
    %7 = math.tanh %6 : vector<64x128xf32>
    %c0_6 = arith.constant 0 : index
    %c0_7 = arith.constant 0 : index
    %8 = vector.load %arg5[%c0_6, %c0_7] : memref<1x128xf32, #tpu.memory_space<vmem>>, vector<1x128xf32>
    %9 = vector.broadcast %8 : vector<1x128xf32> to vector<64x128xf32>
    %10 = arith.mulf %7, %9 : vector<64x128xf32>
    %cst_8 = arith.constant dense<0.000000e+00> : vector<64xf32>
    %11 = vector.multi_reduction <add>, %10, %cst_8 [1] : vector<64x128xf32> to vector<64xf32>
    %12 = vector.shape_cast %11 : vector<64xf32> to vector<64x1xf32>
    %13 = vector.shape_cast %12 : vector<64x1xf32> to vector<8x8x1xf32>
    %c0_9 = arith.constant 0 : index
    %c0_10 = arith.constant 0 : index
    %14 = vector.load %arg1[%c0_9, %c0_10] : memref<8x1xi32, #tpu.memory_space<vmem>>, vector<8x1xi32>
    %15 = tpu.iota {dimensions = array<i32: 1>} : vector<8x8x1xi32>
    %16 = vector.shape_cast %14 : vector<8x1xi32> to vector<8x1x1xi32>
    %17 = vector.broadcast %16 : vector<8x1x1xi32> to vector<8x8x1xi32>
    %18 = arith.cmpi slt, %15, %17 : vector<8x8x1xi32>
    %cst_11 = arith.constant -1.000000e+09 : f32
    %19 = vector.broadcast %cst_11 : f32 to vector<8x8x1xf32>
    %20 = arith.select %18, %13, %19 : vector<8x8x1xi1>, vector<8x8x1xf32>
    %cst_12 = arith.constant dense<0xFF800000> : vector<8x1xf32>
    %21 = vector.multi_reduction <maximumf>, %20, %cst_12 [1] : vector<8x8x1xf32> to vector<8x1xf32>
    %22 = vector.shape_cast %21 : vector<8x1xf32> to vector<8x1x1xf32>
    %23 = vector.broadcast %22 : vector<8x1x1xf32> to vector<8x8x1xf32>
    %24 = arith.subf %20, %23 : vector<8x8x1xf32>
    %25 = math.exp %24 : vector<8x8x1xf32>
    %cst_13 = arith.constant dense<0.000000e+00> : vector<8x1xf32>
    %26 = vector.multi_reduction <add>, %25, %cst_13 [1] : vector<8x8x1xf32> to vector<8x1xf32>
    %27 = vector.shape_cast %26 : vector<8x1xf32> to vector<8x1x1xf32>
    %28 = tpu.reciprocal %27 : vector<8x1x1xf32> -> vector<8x1x1xf32>
    %29 = vector.broadcast %28 : vector<8x1x1xf32> to vector<8x8x1xf32>
    %30 = arith.mulf %25, %29 : vector<8x8x1xf32>
    %31 = arith.extf %0 : vector<8x8x128xbf16> to vector<8x8x128xf32>
    %32 = vector.broadcast %30 : vector<8x8x1xf32> to vector<8x8x128xf32>
    %33 = arith.mulf %31, %32 : vector<8x8x128xf32>
    %cst_14 = arith.constant dense<0.000000e+00> : vector<8x128xf32>
    %34 = vector.multi_reduction <add>, %33, %cst_14 [1] : vector<8x8x128xf32> to vector<8x128xf32>
    %c0_15 = arith.constant 0 : index
    %c0_16 = arith.constant 0 : index
    %35 = vector.load %arg6[%c0_15, %c0_16] : memref<8x128xf32, #tpu.memory_space<vmem>>, vector<8x128xf32>
    tpu.vector_store %arg6[%c0_15, %c0_16], %34 {strides = array<i32>} : memref<8x128xf32, #tpu.memory_space<vmem>>, vector<8x128xf32>,
    return
  }
  func.func @transform_0(%arg0: i32) -> (i32, i32) {
    %c0_i32 = arith.constant 0 : i32
    %c0_i32_0 = arith.constant 0 : i32
    return %arg0, %c0_i32 : i32, i32
  }
  func.func @transform_1(%arg0: i32) -> (i32, i32, i32) {
    %c0_i32 = arith.constant 0 : i32
    %c0_i32_0 = arith.constant 0 : i32
    %c0_i32_1 = arith.constant 0 : i32
    return %arg0, %c0_i32, %c0_i32_0 : i32, i32, i32
  }
  func.func @transform_2(%arg0: i32) -> (i32, i32) {
    %c0_i32 = arith.constant 0 : i32
    %c0_i32_0 = arith.constant 0 : i32
    %c0_i32_1 = arith.constant 0 : i32
    return %c0_i32, %c0_i32_0 : i32, i32
  }
  func.func @transform_3(%arg0: i32) -> (i32, i32) {
    %c0_i32 = arith.constant 0 : i32
    %c0_i32_0 = arith.constant 0 : i32
    %c0_i32_1 = arith.constant 0 : i32
    return %c0_i32, %c0_i32_0 : i32, i32
  }
  func.func @transform_4(%arg0: i32) -> (i32, i32) {
    %c0_i32 = arith.constant 0 : i32
    %c0_i32_0 = arith.constant 0 : i32
    %c0_i32_1 = arith.constant 0 : i32
    return %c0_i32, %c0_i32_0 : i32, i32
  }
  func.func @transform_5(%arg0: i32) -> (i32, i32) {
    %c0_i32 = arith.constant 0 : i32
    %c0_i32_0 = arith.constant 0 : i32
    return %arg0, %c0_i32 : i32, i32
  }
}

</mosaic_0001>

<bundles_post_ra>
// kernel: tpu_custom_call.1
= control target key start
LH: loop header
LB: loop body
LE: loop exit
PB: predicated region body
PF: predicated region fallthrough
CT: control target
= control target key end

     0   :  { %10 = vsyncpa [#allocation3], 0  ;;  %s1675_s0 = inlined_call_operand.vmem [shape: s32[16,1], index: 0, kind: input, shape index: {}]   ;;  %s1676_s1 = inlined_call_operand.hbm [shape: bf16[16,8,128], index: 1, kind: input, shape index: {}]   ;;  %s1677_s2 = inlined_call_operand.hbm [shape: bf16[128,128], index: 2, kind: input, shape index: {}]   ;;  %s1678_s3 = inlined_call_operand.vmem [shape: f32[1,128], index: 3, kind: input, shape index: {}]   ;;  %s1679_s4 = inlined_call_operand.vmem [shape: f32[1,128], index: 4, kind: input, shape index: {}]   ;;  %s1680_s5 = inlined_call_operand.hbm [shape: f32[16,128], index: 5, kind: output, shape index: {}]  }
   0x1   :  { %12 = vsyncpa [#allocation3 + $0x1], 0 }
   0x2   :  { %13 = vsyncpa [#allocation6], 0 }
   0x3   :  { %14 = vsyncpa [#allocation4], 0 }
   0x4   :  { %16 = vsyncpa [#allocation4 + $0x1], 0  ;;  %s1352_s18 = smov 0   ;;  %s1354_s19 = smov 0  }
   0x5   :  { %s1356_s20 = smov 0   ;;  %s1358_s21 = smov 0  }
   0x6 LB: > { %s1373_s22 = sadd.s32 4294967295, %s1316_s21   ;;  %s972_s23 = sadd.s32 4294967294, %s1316_s21   ;;  %s1316_s21 = sphi %s1358_s21, %s1698_s21   ;;  %s1312_s20 = sphi %s1356_s20, %s1697_s20   ;;  %s1308_s19 = sphi %s1354_s19, %s1696_s19   ;;  %s1304_s18 = sphi %s1352_s18, %s1695_s18  }
   0x7   : > { %p68_p0 = scmp.ne.s32.totalorder %s1308_s19, %s1304_s18  ;;  %p69_p1 = scmp.eq.s32.totalorder %s1373_s22, 0 }
   0x8   : > { %p155_p2 = scmp.eq.s32.totalorder %s1373_s22, 1  ;;  %p161_p3 = scmp.eq.s32.totalorder %s972_s23, 1 }
   0x9   : > { %p1382_p4 = por %p69_p1, %p68_p0  ;;  %p973_p5 = scmp.ge.s32.totalorder %s1316_s21, 1 }
   0xa   : > { %p1387_p6 = por %p161_p3, %p68_p0  ;;  %p168_p7 = scmp.lt.s32.totalorder %s1316_s21, 3 }
   0xb   : > { %s179_s28 = sshll.u32 %s1677_s2, 4  ;;  %s1318_s30 = smov [#allocation5]   ;;  %s180_s28 = int_to_ptr.hbm [resolvable:$true] %s179_s28 }
   0xc   : > { %p1395_p8 = pnand %p973_p5, %p168_p7  ;;  %s181_s6 = sshll.u32 %s1318_s30, 4  ;;  %s182_s6 = int_to_ptr.vmem [resolvable:$true] %s181_s6 }
   0xd   : > { %s1405_s7 = sadd.s32 1, %s1316_s21   ;;  %s1681_s8 = smov 64  }
   0xe   : > { %p1081_p9 = pneg %p1395_p8  ;;  %s1320_s9 = smov 4  }
   0xf   : > { %s52_s10 = ssub.s32 %s1316_s21, %s1405_s7  ;;  %s55_s11 = sadd.s32 1, %s1312_s20 }
  0x10   : > { %p1082_p10 = pnand %p1081_p9, %p69_p1  ;;  %p53_p12 = scmp.eq.s32.totalorder %s52_s10, 0 }
  0x11   : > { %p62_p13 = scmp.ne.s32.totalorder %s1312_s20, %s1308_s19  ;;  %p63_p0 = scmp.eq.s32.totalorder %s1316_s21, 0 }
  0x12   : > { %1084 = dma.hbm_to_vmem [thread:$0]  (!%p1082_p10), %s180_s28, 1024, %s182_s6, [#allocation6], %s1681_s8, %s1681_s8, %s1320_s9  }
  0x13   : > { %s1417_s12 = scalar_select %p53_p12, %s1312_s20, %s55_s11  }
  0x14   : > { %p1421_p3 = por %p155_p2, %p62_p13  ;;  %p1094_p5 = scmp.lt.s32.totalorder %s1316_s21, 2 }
  0x15   : > { %s208_s14 = sand.u32 1, %s1312_s20   ;;  %s1036_s15 = sshll.u32 %s1316_s21, 5 }
  0x16   : > { %p64_p7 = por %p63_p0, %p62_p13  ;;  %s976_s16 = sshll.u32 %s208_s14, 5 }
  0x17   : > { %s217_s26 = scalar_lea.hbm %s1676_s1, %s1036_s15  ;;  %s212_s28 = scalar_lea.vmem [#allocation2], %s976_s16 }
  0x18   : > { %s218_s27 = sshll.u32 %s217_s26, 4  ;;  %s220_s30 = sshll.u32 %s212_s28, 4  ;;  %s219_s27 = int_to_ptr.hbm [resolvable:$true] %s218_s27  ;;  %s221_s30 = int_to_ptr.vmem [resolvable:$true] %s220_s30 }
  0x19   : > { %p1431_p9 = pnand %p1094_p5, %p64_p7  ;;  %s209_s10 = scalar_lea.sflag [#allocation3], %s208_s14 }
  0x1a   : > { %s1216_s11 = sshra.s32 %s219_s27, 4  ;;  %s1223_s16 = scalar_lea.hbm %s1676_s1, 64  ;;  %s1217_s11 = int_to_ptr.hbm [resolvable:$true] %s1216_s11 }
  0x1b   : > { %s1218_s8 = scalar_lea.hbm %s1217_s11, 32  ;;  %p1220_p10 = pneg %p1431_p9 }
  0x1c   : > { %p1219_p2 = scmp.ne.s32.totalorder %s1217_s11, %s1218_s8  ;;  %p1224_p0 = scmp.lt.s32.totalorder %s1217_s11, %s1676_s1 }
  0x1d   : > { %p1225_p5 = scmp.lt.s32.totalorder %s1223_s16, %s1218_s8 }
  0x1e   : > { %p1221_p12 = pnand %p1220_p10, %p1219_p2 }
  0x1f   : > { %p1226_p7 = por %p1225_p5, %p1224_p0 }
  0x20   : > { %p1222_p13 = pneg %p1221_p12 }
  0x22   : > { %p1227_p11 = pnand %p1226_p7, %p1222_p13 }
  0x24   : > { %1230 = shalt.err (!%p1227_p11)
}
  0x25   : > { %s1687_s14 = smov 64   ;;  %232 = sbr.rel (%p1395_p8) target bundleno = 543 (0x21f), region = 40 }
  0x26   : > { %1088 = dma.hbm_to_vmem [thread:$0]  (!%p1431_p9), %s219_s27, 512, %s221_s30, %s209_s10, %s1687_s14, %s1687_s14, %s1320_s9  }
  0x27   : > { %s1451_s28 = sand.u32 (!%p1395_p8), 1, %s1308_s19  }
  0x28   : > { %s980_s11 = sshll.u32 (!%p1395_p8), %s1451_s28, 5  ;;  %s235_s8 = scalar_lea.sflag (!%p1395_p8), [#allocation3], %s1451_s28 }
  0x29   : > { %s1455_s15 = scalar_lea.vmem (!%p1395_p8), [#allocation2], %s980_s11 }
  0x2a   : > { %1291 = dma.done.wait (%p1382_p4), %s235_s8, 512  }
  0x2b   : > { %1293 = vsyncadd (%p1382_p4), %s235_s8, 4294966784 }
  0x2c   : > { %1295 = dma.done.wait (%p69_p1), [#allocation6], 1024  }
  0x2d   : > { %1297 = vsyncadd (%p69_p1), [#allocation6], 4294966272  ;;  %v1048_v0 = vld [vmem:[#allocation5 + $0x38] sm:$0xff]  ;;  %v1047_v1 = vld [vmem:[#allocation5 + $0x30] sm:$0xff]  ;;  %p275_p1 = scmp.lt.s32.totalorder %s1373_s22, 1  ;;  %v446_v47 = vlaneseq  ;;  %vm479_vm2 = vcmask 7168  }
  0x2e   : > { %380 = vmatpush.bf16.msra.mxu0 %v1048_v0  ;;  %1049 = vmatpush.bf16.msra.mxu1 %v1048_v0  ;;  %v1046_v2 = vld [vmem:[#allocation5 + $0x28] sm:$0xff]  ;;  %v1045_v3 = vld [vmem:[#allocation5 + $0x20] sm:$0xff]  ;;  %v1044_v4 = vld [vmem:[#allocation5 + $0x18] sm:$0xff]  ;;  %s982_s23 = sshll.u32 %s1451_s28, 3  ;;  %s1033_s26 = sshll.u32 %s1373_s22, 3 }
  0x2f   : > { %1050 = vmatpush.bf16.msra.mxu2 %v1048_v0  ;;  %1051 = vmatpush.bf16.msra.mxu3 %v1048_v0  ;;  %v1043_v5 = vld [vmem:[#allocation5 + $0x10] sm:$0xff]  ;;  %v1042_v6 = vld [vmem:[#allocation5 + $0x8] sm:$0xff]  ;;  %v1041_v7 = vld [vmem:[#allocation5] sm:$0xff]  ;;  %s276_s30 = scalar_select %p275_p1, %s1373_s22, 1  ;;  %v1480_v49 = vshrl.u32 %v446_v47, 7 }
  0x30   : > { %v1037_v8 = vld [vmem:[%s1455_s15] sm:$0xff]  ;;  %v1038_v9 = vld [vmem:[%s1455_s15 + $0x8] sm:$0xff]  ;;  %v1039_v10 = vld [vmem:[%s1455_s15 + $0x10] sm:$0xff]  ;;  %s875_s8 = scalar_lea.hbm %s1680_s5, %s1033_s26  ;;  %s865_s29 = scalar_lea.sflag [#allocation4], %s1451_s28 }
  0x31   : > { %v1040_v11 = vld [vmem:[%s1455_s15 + $0x18] sm:$0xff]  ;;  %v1136_v12 = vld [vmem:[%s1678_s3] ss:$0 sm:$0xff]  ;;  %s983_s6 = sshll.u32 %s276_s30, 3  ;;  %s879_s24 = sshll.u32 %s875_s8, 4  ;;  %s880_s24 = int_to_ptr.hbm [resolvable:$true] %s879_s24 }
  0x32   : > { %381 = vmatpush.bf16.msra.mxu0 %v1047_v1  ;;  %1052 = vmatpush.bf16.msra.mxu1 %v1047_v1  ;;  %v1137_v17 = vld [vmem:[%s1679_s4] ss:$0 sm:$0xff]  ;;  %s278_s16 = scalar_lea.vmem %s1675_s0, %s983_s6  ;;  %s1260_s9 = sshra.s32 %s880_s24, 4  ;;  %s1261_s9 = int_to_ptr.hbm [resolvable:$true] %s1260_s9 }
  0x33   : > { %1053 = vmatpush.bf16.msra.mxu2 %v1047_v1  ;;  %1054 = vmatpush.bf16.msra.mxu3 %v1047_v1  ;;  %v445_v46 = vld [vmem:[%s278_s16] sm:$0xff]  ;;  %s1262_s27 = scalar_lea.hbm %s1261_s9, 8  ;;  %s1266_s10 = scalar_lea.hbm %s1680_s5, 16 }
  0x34   : > { %v449_v48 = vrot.slane %v445_v46, 2  ;;  %v455_v50 = vperm.slane %v445_v46, 0  ;;  %v451_v52 = vrot.slane %v445_v46, 4  ;;  %v448_v53 = vrot.slane %v445_v46, 1  ;;  %p1263_p4 = scmp.ne.s32.totalorder %s1261_s9, %s1262_s27  ;;  %p1267_p9 = scmp.lt.s32.totalorder %s1261_s9, %s1680_s5 }
  0x35   : > { %v450_v55 = vrot.slane %v445_v46, 3  ;;  %p1268_p2 = scmp.lt.s32.totalorder %s1266_s10, %s1262_s27 }
  0x36   : > { %382 = vmatpush.bf16.msra.mxu0 %v1046_v2  ;;  %1055 = vmatpush.bf16.msra.mxu1 %v1046_v2  ;;  %v457_v51 = vperm.slane %v449_v48, 0  ;;  %vm463_vm0 = vcmp.lt.s32.totalorder %v1480_v49, %v455_v50  ;;  %v459_v58 = vperm.slane %v451_v52, 0  ;;  %v456_v63 = vperm.slane %v448_v53, 0  ;;  %p1264_p8 = pnand %p1263_p4, %p1421_p3 }
  0x37   : > { %1056 = vmatpush.bf16.msra.mxu2 %v1046_v2  ;;  %1057 = vmatpush.bf16.msra.mxu3 %v1046_v2  ;;  %v458_v1 = vperm.slane %v450_v55, 0  ;;  %p1269_p10 = por %p1268_p2, %p1267_p9 }
  0x38   : > { %vm465_vm1 = vcmp.lt.s32.totalorder %v1480_v49, %v457_v51  ;;  %vm467_vm3 = vcmp.lt.s32.totalorder %v1480_v49, %v459_v58  ;;  %vm464_vm4 = vcmp.lt.s32.totalorder %v1480_v49, %v456_v63  ;;  %p1265_p11 = pneg %p1264_p8 }
  0x39   : > { %vm466_vm5 = vcmp.lt.s32.totalorder %v1480_v49, %v458_v1 }
  0x3a   : > { %383 = vmatpush.bf16.msra.mxu0 %v1045_v3  ;;  %1058 = vmatpush.bf16.msra.mxu1 %v1045_v3  ;;  %p1270_p12 = pnand %p1269_p10, %p1265_p11 }
  0x3b   : > { %1059 = vmatpush.bf16.msra.mxu2 %v1045_v3  ;;  %1060 = vmatpush.bf16.msra.mxu3 %v1045_v3  ;;  %v452_v3 = vrot.slane %v445_v46, 5 }
  0x3e   : > { %384 = vmatpush.bf16.msra.mxu0 %v1044_v4  ;;  %1061 = vmatpush.bf16.msra.mxu1 %v1044_v4 }
  0x3f   : > { %1062 = vmatpush.bf16.msra.mxu2 %v1044_v4  ;;  %1063 = vmatpush.bf16.msra.mxu3 %v1044_v4 }
  0x42   : > { %385 = vmatpush.bf16.msra.mxu0 %v1043_v5  ;;  %1064 = vmatpush.bf16.msra.mxu1 %v1043_v5 }
  0x43   : > { %1065 = vmatpush.bf16.msra.mxu2 %v1043_v5  ;;  %1066 = vmatpush.bf16.msra.mxu3 %v1043_v5  ;;  %v454_v5 = vrot.slane %v445_v46, 7 }
  0x46   : > { %386 = vmatpush.bf16.msra.mxu0 %v1042_v6  ;;  %1067 = vmatpush.bf16.msra.mxu1 %v1042_v6 }
  0x47   : > { %1068 = vmatpush.bf16.msra.mxu2 %v1042_v6  ;;  %1069 = vmatpush.bf16.msra.mxu3 %v1042_v6 }
  0x4a   : > { %387 = vmatpush.bf16.msra.mxu0 %v1041_v7  ;;  %1070 = vmatpush.bf16.msra.mxu1 %v1041_v7 }
  0x4b   : > { %1071 = vmatpush.bf16.msra.mxu2 %v1041_v7  ;;  %1072 = vmatpush.bf16.msra.mxu3 %v1041_v7 }
  0x4d   : > { %388 = vmatmul.bf16.vlgmr.msra.gmra.mxu0 %v1037_v8  ;;  %393 = vmatmul.bf16.vlgmr.msra.gmra.mxu1 %v1038_v9  ;;  %v453_v8 = vrot.slane %v445_v46, 6 }
  0x4e   : > { %398 = vmatmul.bf16.vlgmr.msra.gmra.mxu2 %v1039_v10  ;;  %403 = vmatmul.bf16.vlgmr.msra.gmra.mxu3 %v1040_v11 }
  0xca   : > { %v389_v13 = vpop.f32.mrf.mxu0  ;;  %v394_v14 = vpop.f32.mrf.mxu1 }
  0xcb   : > { %v390_v15 = vadd.f32 %v1136_v12, %v389_v13  ;;  %v395_v16 = vadd.f32 %v1136_v12, %v394_v14  ;;  %v460_v14 = vperm.slane %v452_v3, 0 }
  0xcd   : > { %1138 = vtanh.f32 %v390_v15  ;;  %vm468_vm6 = vcmp.lt.s32.totalorder %v1480_v49, %v460_v14 }
  0xce   : > { %1140 = vtanh.f32 %v395_v16 }
  0xd1   : > { %v399_v18 = vpop.f32.mrf.mxu2  ;;  %v404_v19 = vpop.f32.mrf.mxu3 }
  0xd2   : > { %v400_v20 = vadd.f32 %v1136_v12, %v399_v18  ;;  %v391_v21 = vpop.f32.mrf.mxu0  ;;  %v396_v22 = vpop.f32.mrf.mxu1  ;;  %v405_v29 = vadd.f32 %v1136_v12, %v404_v19  ;;  %v462_v19 = vperm.slane %v454_v5, 0 }
  0xd3   : > { %v1139_v23 = vpop.eup %1138  ;;  %v392_v24 = vadd.f32 %v1136_v12, %v391_v21  ;;  %v397_v25 = vadd.f32 %v1136_v12, %v396_v22 }
  0xd4   : > { %v1141_v26 = vpop.eup %1140  ;;  %1142 = vtanh.f32 %v400_v20  ;;  %v421_v27 = vmul.f32 %v1139_v23, %v1137_v17  ;;  %v461_v23 = vperm.slane %v453_v8, 0  ;;  %vm470_vm7 = vcmp.lt.s32.totalorder %v1480_v49, %v462_v19 }
  0xd5   : > { %v423_v28 = vmul.f32 %v1141_v26, %v1137_v17  ;;  %1144 = vtanh.f32 %v392_v24 }
  0xd6   : > { %429 = vadd.xlane.f32.xlu0 %v421_v27  ;;  %1146 = vtanh.f32 %v397_v25  ;;  %vm469_vm8 = vcmp.lt.s32.totalorder %v1480_v49, %v461_v23 }
  0xd7   : > { %433 = vadd.xlane.f32.xlu1 %v423_v28  ;;  %1148 = vtanh.f32 %v405_v29 }
  0xd9   : > { %v401_v30 = vpop.f32.mrf.mxu2  ;;  %v406_v31 = vpop.f32.mrf.mxu3 }
  0xda   : > { %v1143_v32 = vpop.eup %1142  ;;  %v402_v33 = vadd.f32 %v1136_v12, %v401_v30  ;;  %v407_v34 = vadd.f32 %v1136_v12, %v406_v31 }
  0xdb   : > { %v425_v35 = vmul.f32 %v1143_v32, %v1137_v17  ;;  %v1145_v36 = vpop.eup %1144 }
  0xdc   : > { %1150 = vtanh.f32 %v402_v33  ;;  %v1147_v37 = vpop.eup %1146  ;;  %v422_v38 = vmul.f32 %v1145_v36, %v1137_v17 }
  0xdd   : > { %1152 = vtanh.f32 %v407_v34  ;;  %437 = vadd.xlane.f32.xlu2 %v425_v35  ;;  %v424_v39 = vmul.f32 %v1147_v37, %v1137_v17  ;;  %v1149_v40 = vpop.eup %1148 }
  0xde   : > { %431 = vadd.xlane.f32.xlu0 %v422_v38  ;;  %v427_v44 = vmul.f32 %v1149_v40, %v1137_v17 }
  0xdf   : > { %435 = vadd.xlane.f32.xlu1 %v424_v39 }
  0xe2   : > { %v1151_v41 = vpop.eup %1150 }
  0xe3   : > { %v1153_v42 = vpop.eup %1152  ;;  %v426_v43 = vmul.f32 %v1151_v41, %v1137_v17 }
  0xe4   : > { %v428_v45 = vmul.f32 %v1153_v42, %v1137_v17 }
  0xe5   : > { %439 = vadd.xlane.f32.xlu2 %v426_v43 }
  0xe6   : > { %441 = vadd.xlane.f32.xlu0 %v427_v44 }
  0xe7   : > { %443 = vadd.xlane.f32.xlu1 %v428_v45 }
 0x149   : > { %v430_v54 = vpop.xlane.xlu0 %429 }
 0x14a   : > { %v434_v56 = vpop.xlane.xlu1 %433  ;;  %v471_v57 = vsel %vm463_vm0, %v430_v54, -1e+09 }
 0x14b   : > { %v473_v59 = vsel %vm465_vm1, %v434_v56, -1e+09  ;;  %v480_v60 = vsel %vm479_vm2, %v471_v57, -inf }
 0x14c   : > { %v494_v61 = vsel %vm479_vm2, %v473_v59, -inf  ;;  %v481_v62 = vrot.slane %v480_v60, 4 }
 0x14d   : > { %v495_v0 = vrot.slane %v494_v61, 4 }
 0x14e   : > { %v482_v2 = vmax.f32 %v480_v60, %v481_v62 }
 0x14f   : > { %v496_v4 = vmax.f32 %v494_v61, %v495_v0 }
 0x150   : > { %v483_v6 = vrot.slane %v482_v2, 2  ;;  %v438_v7 = vpop.xlane.xlu2 %437 }
 0x151   : > { %v497_v9 = vrot.slane %v496_v4, 2  ;;  %v475_v10 = vsel %vm467_vm3, %v438_v7, -1e+09  ;;  %v432_v13 = vpop.xlane.xlu0 %431 }
 0x152   : > { %v484_v11 = vmax.f32 %v482_v2, %v483_v6  ;;  %v508_v12 = vsel %vm479_vm2, %v475_v10, -inf  ;;  %v436_v17 = vpop.xlane.xlu1 %435  ;;  %v472_v18 = vsel %vm464_vm4, %v432_v13, -1e+09 }
 0x153   : > { %v498_v15 = vmax.f32 %v496_v4, %v497_v9  ;;  %v509_v16 = vrot.slane %v508_v12, 4  ;;  %v474_v21 = vsel %vm466_vm5, %v436_v17, -1e+09  ;;  %v487_v22 = vsel %vm479_vm2, %v472_v18, -inf }
 0x154   : > { %v485_v20 = vrot.slane %v484_v11, 1  ;;  %v501_v26 = vsel %vm479_vm2, %v474_v21, -inf  ;;  %v488_v27 = vrot.slane %v487_v22, 4 }
 0x155   : > { %v499_v24 = vrot.slane %v498_v15, 1  ;;  %v510_v25 = vmax.f32 %v508_v12, %v509_v16  ;;  %v502_v29 = vrot.slane %v501_v26, 4 }
 0x156   : > { %v486_v28 = vmax.f32 %v484_v11, %v485_v20  ;;  %v489_v32 = vmax.f32 %v487_v22, %v488_v27 }
 0x157   : > { %v500_v30 = vmax.f32 %v498_v15, %v499_v24  ;;  %v511_v31 = vrot.slane %v510_v25, 2  ;;  %v503_v34 = vmax.f32 %v501_v26, %v502_v29 }
 0x158   : > { %v536_v33 = vsub.f32 %v471_v57, %v486_v28  ;;  %v440_v35 = vpop.xlane.xlu2 %439  ;;  %v490_v38 = vrot.slane %v489_v32, 2 }
 0x159   : > { %v538_v36 = vsub.f32 %v473_v59, %v500_v30  ;;  %v512_v37 = vmax.f32 %v510_v25, %v511_v31  ;;  %v476_v39 = vsel %vm468_vm6, %v440_v35, -1e+09  ;;  %v504_v41 = vrot.slane %v503_v34, 2  ;;  %v442_v43 = vpop.xlane.xlu0 %441 }
 0x15a   : > { %v544_v40 = vmul.f32 1.442695, %v536_v33  ;;  %v515_v42 = vsel %vm479_vm2, %v476_v39, -inf  ;;  %v491_v46 = vmax.f32 %v489_v32, %v490_v38  ;;  %v444_v48 = vpop.xlane.xlu1 %443  ;;  %v1502_v52 = vsel %vm469_vm8, %v442_v43, -1e+09 }
 0x15b   : > { %v548_v44 = vmul.f32 1.442695, %v538_v36  ;;  %v513_v45 = vrot.slane %v512_v37, 1  ;;  %v516_v47 = vrot.slane %v515_v42, 4  ;;  %v505_v50 = vmax.f32 %v503_v34, %v504_v41 }
 0x15c   : > { %1154 = vpow2.f32 %v544_v40  ;;  %v1498_v51 = vsel %vm470_vm7, %v444_v48, -1e+09  ;;  %v492_v54 = vrot.slane %v491_v46, 1  ;;  %v522_v58 = vsel %vm479_vm2, %v1502_v52, -inf }
 0x15d   : > { %1156 = vpow2.f32 %v548_v44  ;;  %v514_v53 = vmax.f32 %v512_v37, %v513_v45  ;;  %v517_v55 = vmax.f32 %v515_v42, %v516_v47  ;;  %v506_v56 = vrot.slane %v505_v50, 1 }
 0x15e   : > { %v529_v57 = vsel %vm479_vm2, %v1498_v51, -inf  ;;  %v493_v60 = vmax.f32 %v491_v46, %v492_v54  ;;  %v523_v0 = vrot.slane %v522_v58, 4  ;;  %v1321_v25 = vmov 0  }
 0x15f   : > { %v540_v59 = vsub.f32 %v475_v10, %v514_v53  ;;  %v518_v61 = vrot.slane %v517_v55, 2  ;;  %v530_v62 = vrot.slane %v529_v57, 4  ;;  %v507_v63 = vmax.f32 %v505_v50, %v506_v56  ;;  %1135 = vset.pattern.permute.xlu1 %v1321_v25  ;;  %1133 = vset.pattern.permute.xlu2 %v1321_v25 }
 0x160   : > { %v537_v1 = vsub.f32 %v472_v18, %v493_v60  ;;  %v524_v6 = vmax.f32 %v522_v58, %v523_v0  ;;  %1134 = vset.pattern.permute.xlu0 %v1321_v25 }
 0x161   : > { %v552_v49 = vmul.f32 1.442695, %v540_v59  ;;  %v519_v2 = vmax.f32 %v517_v55, %v518_v61  ;;  %v531_v3 = vmax.f32 %v529_v57, %v530_v62  ;;  %v539_v5 = vsub.f32 %v474_v21, %v507_v63 }
 0x162   : > { %v1508_v4 = vpop.eup %1154  ;;  %v546_v9 = vmul.f32 1.442695, %v537_v1  ;;  %v525_v17 = vrot.slane %v524_v6, 2 }
 0x163   : > { %v1510_v7 = vpop.eup %1156  ;;  %v560_v8 = vsel %vm479_vm2, %v1508_v4, 0.0  ;;  %1158 = vpow2.f32 %v552_v49  ;;  %v520_v10 = vrot.slane %v519_v2, 1  ;;  %v550_v13 = vmul.f32 1.442695, %v539_v5 }
 0x164   : > { %v574_v11 = vsel %vm479_vm2, %v1510_v7, 0.0  ;;  %v561_v12 = vrot.slane %v560_v8, 4  ;;  %v532_v14 = vrot.slane %v531_v3, 2  ;;  %1160 = vpow2.f32 %v546_v9 }
 0x165   : > { %v575_v15 = vrot.slane %v574_v11, 4  ;;  %v521_v16 = vmax.f32 %v519_v2, %v520_v10  ;;  %1162 = vpow2.f32 %v550_v13  ;;  %v526_v22 = vmax.f32 %v524_v6, %v525_v17 }
 0x166   : > { %v562_v18 = vadd.f32 %v561_v12, %v560_v8  ;;  %v533_v19 = vmax.f32 %v531_v3, %v532_v14 }
 0x167   : > { %v576_v20 = vadd.f32 %v575_v15, %v574_v11  ;;  %v541_v21 = vsub.f32 %v476_v39, %v521_v16  ;;  %v527_v29 = vrot.slane %v526_v22, 1 }
 0x168   : > { %v563_v23 = vrot.slane %v562_v18, 2  ;;  %v534_v24 = vrot.slane %v533_v19, 1 }
 0x169   : > { %v1516_v26 = vpop.eup %1158  ;;  %v577_v27 = vrot.slane %v576_v20, 2  ;;  %v554_v28 = vmul.f32 1.442695, %v541_v21  ;;  %v528_v36 = vmax.f32 %v526_v22, %v527_v29 }
 0x16a   : > { %v564_v30 = vadd.f32 %v563_v23, %v562_v18  ;;  %v588_v31 = vsel %vm479_vm2, %v1516_v26, 0.0  ;;  %v535_v32 = vmax.f32 %v533_v19, %v534_v24  ;;  %v1520_v33 = vpop.eup %1160 }
 0x16b   : > { %v578_v34 = vadd.f32 %v577_v27, %v576_v20  ;;  %v589_v35 = vrot.slane %v588_v31, 4  ;;  %1164 = vpow2.f32 %v554_v28  ;;  %v1522_v37 = vpop.eup %1162  ;;  %v567_v39 = vsel %vm479_vm2, %v1520_v33, 0.0 }
 0x16c   : > { %v565_v38 = vrot.slane %v564_v30, 1  ;;  %v543_v40 = vsub.f32 %v1498_v51, %v535_v32  ;;  %v581_v43 = vsel %vm479_vm2, %v1522_v37, 0.0  ;;  %v568_v44 = vrot.slane %v567_v39, 4 }
 0x16d   : > { %v579_v41 = vrot.slane %v578_v34, 1  ;;  %v590_v42 = vadd.f32 %v589_v35, %v588_v31  ;;  %v582_v46 = vrot.slane %v581_v43, 4  ;;  %v542_v48 = vsub.f32 %v1502_v52, %v528_v36 }
 0x16e   : > { %v1529_v45 = vadd.f32 %v565_v38, %v564_v30  ;;  %v558_v47 = vmul.f32 1.442695, %v543_v40  ;;  %v569_v54 = vadd.f32 %v568_v44, %v567_v39 }
 0x16f   : > { %v1532_v50 = vadd.f32 %v579_v41, %v578_v34  ;;  %v591_v53 = vrot.slane %v590_v42, 2  ;;  %v583_v55 = vadd.f32 %v582_v46, %v581_v43  ;;  %v556_v51 = vmul.f32 1.442695, %v542_v48 }
 0x170   : > { %1166 = vrcp.f32 %v1529_v45  ;;  %v570_v58 = vrot.slane %v569_v54, 2  ;;  %vm621_vm10 = vweird.f32 %v1529_v45  ;;  %v625_v8 = vand.u32 2147483647, %v1529_v45 }
 0x171   : > { %v1535_v56 = vpop.eup %1164  ;;  %1168 = vrcp.f32 %v1532_v50  ;;  %v592_v57 = vadd.f32 %v591_v53, %v590_v42  ;;  %v584_v59 = vrot.slane %v583_v55, 2  ;;  %v653_v0 = vand.u32 2147483647, %v1532_v50 }
 0x172   : > { %v595_v60 = vsel %vm479_vm2, %v1535_v56, 0.0  ;;  %1170 = vpow2.f32 %v558_v47  ;;  %v571_v61 = vadd.f32 %v570_v58, %v569_v54  ;;  %v655_v49 = vand.u32 2147483648, %v1532_v50 }
 0x173   : > { %v593_v52 = vrot.slane %v592_v57, 1  ;;  %v596_v62 = vrot.slane %v595_v60, 4  ;;  %1172 = vpow2.f32 %v556_v51  ;;  %v585_v63 = vadd.f32 %v584_v59, %v583_v55 }
 0x174   : > { %v572_v2 = vrot.slane %v571_v61, 1  ;;  %vm649_vm9 = vweird.f32 %v1532_v50  ;;  %vm1556_vm11 = vcmp.eq.f32.partialorder %v653_v0, 8.507059e+37  ;;  %v656_v17 = vor.u32 1.1754944e-38, %v655_v49 }
 0x175   : > { %v1542_v1 = vadd.f32 %v593_v52, %v592_v57  ;;  %v597_v3 = vadd.f32 %v596_v62, %v595_v60  ;;  %v586_v6 = vrot.slane %v585_v63, 1  ;;  %v627_v18 = vand.u32 2147483648, %v1529_v45 }
 0x176   : > { %v1167_v5 = vpop.eup %1166  ;;  %v1548_v10 = vadd.f32 %v572_v2, %v571_v61  ;;  %vm1568_vm12 = vcmp.eq.f32.partialorder %v625_v8, 8.507059e+37 }
 0x177   : > { %v1169_v9 = vpop.eup %1168  ;;  %1174 = vrcp.f32 %v1542_v1  ;;  %v598_v11 = vrot.slane %v597_v3, 2  ;;  %v617_v12 = vmul.f32 %v1167_v5, %v1529_v45  ;;  %v1553_v14 = vadd.f32 %v586_v6, %v585_v63 }
 0x178   : > { %v1551_v13 = vpop.eup %1170  ;;  %v645_v15 = vmul.f32 %v1169_v9, %v1532_v50  ;;  %1176 = vrcp.f32 %v1548_v10  ;;  %vm622_vm13 = vweird.f32 %v1167_v5  ;;  %vm650_vm14 = vweird.f32 %v1169_v9 }
 0x179   : > { %v1561_v19 = vpop.eup %1172  ;;  %v599_v20 = vadd.f32 %v598_v11, %v597_v3  ;;  %v609_v21 = vsel %vm479_vm2, %v1551_v13, 0.0  ;;  %v618_v22 = vsub.f32 1.0, %v617_v12  ;;  %1178 = vrcp.f32 %v1553_v14  ;;  %vm623_vm15 = vmor %vm621_vm10, %vm622_vm13 }
 0x17a   : > { %v610_v23 = vrot.slane %v609_v21, 4  ;;  %v602_v24 = vsel %vm479_vm2, %v1561_v19, 0.0  ;;  %v646_v25 = vsub.f32 1.0, %v645_v15  ;;  %v628_v39 = vor.u32 1.1754944e-38, %v627_v18  ;;  %vm651_vm0 = vmor %vm649_vm9, %vm650_vm14 }
 0x17b   : > { %v600_v28 = vrot.slane %v599_v20, 1  ;;  %v603_v29 = vrot.slane %v602_v24, 4  ;;  %v619_v30 = vmul.f32 %v1167_v5, %v618_v22  ;;  %v681_v43 = vand.u32 2147483647, %v1542_v1 }
 0x17c   : > { %v611_v31 = vadd.f32 %v610_v23, %v609_v21  ;;  %v647_v32 = vmul.f32 %v1169_v9, %v646_v25  ;;  %v683_v48 = vand.u32 2147483648, %v1542_v1  ;;  %vm677_vm2 = vweird.f32 %v1542_v1 }
 0x17d   : > { %v1175_v34 = vpop.eup %1174  ;;  %v1573_v35 = vadd.f32 %v600_v28, %v599_v20  ;;  %v604_v36 = vadd.f32 %v603_v29, %v602_v24  ;;  %v620_v38 = vadd.f32 %v1167_v5, %v619_v30  ;;  %vm682_vm4 = vcmp.eq.f32.partialorder %v681_v43, 8.507059e+37 }
 0x17e   : > { %v612_v40 = vrot.slane %v611_v31, 2  ;;  %v648_v41 = vadd.f32 %v1169_v9, %v647_v32  ;;  %v673_v42 = vmul.f32 %v1175_v34, %v1542_v1  ;;  %v1177_v44 = vpop.eup %1176  ;;  %vm678_vm1 = vweird.f32 %v1175_v34 }
 0x17f   : > { %1180 = vrcp.f32 %v1573_v35  ;;  %v605_v46 = vrot.slane %v604_v36, 2  ;;  %v624_v47 = vsel %vm623_vm15, %v1167_v5, %v620_v38  ;;  %v1588_v59 = vpop.eup %1178  ;;  %v631_v61 = vmul.f32 %v1177_v44, %v1548_v10  ;;  %vm679_vm3 = vmor %vm677_vm2, %vm678_vm1 }
 0x180   : > { %v613_v53 = vadd.f32 %v612_v40, %v611_v31  ;;  %v652_v54 = vsel %vm651_vm0, %v1169_v9, %v648_v41  ;;  %v629_v45 = vsel %vm1568_vm12, %v628_v39, %v624_v47  ;;  %v674_v55 = vsub.f32 1.0, %v673_v42 }
 0x181   : > { %v606_v51 = vadd.f32 %v605_v46, %v604_v36  ;;  %v657_v57 = vsel %vm1556_vm11, %v656_v17, %v652_v54  ;;  %v728_v58 = vmul.f32 %v1508_v4, %v629_v45  ;;  %v632_v49 = vsub.f32 1.0, %v631_v61 }
 0x182   : > { %v614_v50 = vrot.slane %v613_v53, 1  ;;  %v730_v60 = vmul.f32 %v1510_v7, %v657_v57  ;;  %v675_v52 = vmul.f32 %v1175_v34, %v674_v55  ;;  %v639_v4 = vand.u32 2147483647, %v1548_v10 }
 0x183   : > { %v607_v62 = vrot.slane %v606_v51, 1  ;;  %746 = vperm.xlu2 %1133, %v728_v58   ;;  %v684_v7 = vor.u32 1.1754944e-38, %v683_v48  ;;  %v641_v5 = vand.u32 2147483648, %v1548_v10  ;;  %v633_v1 = vmul.f32 %v1177_v44, %v632_v49  ;;  %v283_v49 = vld [vmem:[%s1455_s15 + $0x8] sm:$0xff]  }
 0x184   : > { %v1593_v63 = vadd.f32 %v614_v50, %v613_v53  ;;  %756 = vperm.xlu1 %1135, %v730_v60   ;;  %v676_v0 = vadd.f32 %v1175_v34, %v675_v52  ;;  %vm636_vm5 = vweird.f32 %v1177_v44  ;;  %vm635_vm6 = vweird.f32 %v1548_v10 }
 0x185   : > { %v1181_v2 = vpop.eup %1180  ;;  %v1596_v3 = vadd.f32 %v607_v62, %v606_v51  ;;  %v634_v11 = vadd.f32 %v1177_v44, %v633_v1  ;;  %vm640_vm7 = vcmp.eq.f32.partialorder %v639_v4, 8.507059e+37  ;;  %v695_v12 = vand.u32 2147483647, %v1573_v35  ;;  %vm637_vm8 = vmor %vm635_vm6, %vm636_vm5 }
 0x186   : > { %1182 = vrcp.f32 %v1593_v63  ;;  %v680_v6 = vsel %vm679_vm3, %v1175_v34, %v676_v0  ;;  %v687_v9 = vmul.f32 %v1181_v2, %v1573_v35  ;;  %v642_v16 = vor.u32 1.1754944e-38, %v641_v5 }
 0x187   : > { %1184 = vrcp.f32 %v1596_v3  ;;  %v685_v8 = vsel %vm682_vm4, %v684_v7, %v680_v6  ;;  %v659_v18 = vmul.f32 %v1588_v59, %v1553_v14  ;;  %v638_v20 = vsel %vm637_vm8, %v1177_v44, %v634_v11  ;;  %v284_v7 = vld [vmem:[%s1455_s15 + $0x10] sm:$0xff]   ;;  %v286_v11 = vld [vmem:[%s1455_s15 + $0x18] sm:$0xff]  }
 0x188   : > { %v732_v15 = vmul.f32 %v1516_v26, %v685_v8  ;;  %v688_v17 = vsub.f32 1.0, %v687_v9  ;;  %vm692_vm9 = vweird.f32 %v1181_v2  ;;  %v697_v21 = vand.u32 2147483648, %v1573_v35 }
 0x189   : > { %v667_v22 = vand.u32 2147483647, %v1553_v14  ;;  %v643_v23 = vsel %vm640_vm7, %v642_v16, %v638_v20  ;;  %v660_v24 = vsub.f32 1.0, %v659_v18  ;;  %v669_v25 = vand.u32 2147483648, %v1553_v14 }
 0x18a   : > { %v689_v10 = vmul.f32 %v1181_v2, %v688_v17  ;;  %v729_v26 = vmul.f32 %v1520_v33, %v643_v23  ;;  %vm691_vm10 = vweird.f32 %v1573_v35  ;;  %vm1613_vm11 = vcmp.eq.f32.partialorder %v695_v12, 8.507059e+37 }
 0x18b   : > { %766 = vperm.xlu2 %1133, %v732_v15   ;;  %v661_v31 = vmul.f32 %v1588_v59, %v660_v24  ;;  %vm664_vm12 = vweird.f32 %v1588_v59  ;;  %vm693_vm13 = vmor %vm691_vm10, %vm692_vm9  ;;  %v698_v34 = vor.u32 1.1754944e-38, %v697_v21  ;;  %vm663_vm14 = vweird.f32 %v1553_v14 }
 0x18c   : > { %v1183_v27 = vpop.eup %1182  ;;  %v690_v30 = vadd.f32 %v1181_v2, %v689_v10  ;;  %751 = vperm.xlu0 %1134, %v729_v26   ;;  %vm668_vm15 = vcmp.eq.f32.partialorder %v667_v22, 8.507059e+37  ;;  %v670_v38 = vor.u32 1.1754944e-38, %v669_v25  ;;  %vm665_vm0 = vmor %vm663_vm14, %vm664_vm12  ;;  %v723_v41 = vand.u32 2147483647, %v1593_v63 }
 0x18d   : > { %v1185_v29 = vpop.eup %1184  ;;  %v715_v32 = vmul.f32 %v1183_v27, %v1593_v63  ;;  %v662_v36 = vadd.f32 %v1588_v59, %v661_v31  ;;  %v725_v42 = vand.u32 2147483648, %v1593_v63  ;;  %vm720_vm1 = vweird.f32 %v1183_v27 }
 0x18e   : > { %v701_v33 = vmul.f32 %v1185_v29, %v1596_v3  ;;  %v694_v35 = vsel %vm693_vm13, %v1181_v2, %v690_v30  ;;  %vm706_vm2 = vweird.f32 %v1185_v29  ;;  %v711_v53 = vand.u32 2147483648, %v1596_v3 }
 0x18f   : > { %v716_v39 = vsub.f32 1.0, %v715_v32  ;;  %v699_v40 = vsel %vm1613_vm11, %v698_v34, %v694_v35  ;;  %v666_v14 = vsel %vm665_vm0, %v1588_v59, %v662_v36  ;;  %vm719_vm3 = vweird.f32 %v1593_v63  ;;  %v280_v63 = vld [vmem:[%s1455_s15] sm:$0xff]   ;;  %s274_s15 = scalar_lea.vmem [#allocation7], %s982_s23 }
 0x190   : > { %v702_v43 = vsub.f32 1.0, %v701_v33  ;;  %v733_v44 = vmul.f32 %v1535_v56, %v699_v40  ;;  %v671_v47 = vsel %vm668_vm15, %v670_v38, %v666_v14  ;;  %v709_v55 = vand.u32 2147483647, %v1596_v3  ;;  %vm721_vm4 = vmor %vm719_vm3, %vm720_vm1  ;;  %s877_s22 = sshll.u32 %s274_s15, 4  ;;  %s878_s22 = int_to_ptr.vmem [resolvable:$true] %s877_s22 }
 0x191   : > { %v717_v46 = vmul.f32 %v1183_v27, %v716_v39  ;;  %v731_v54 = vmul.f32 %v1522_v37, %v671_v47  ;;  %v726_v51 = vor.u32 1.1754944e-38, %v725_v42  ;;  %vm705_vm5 = vweird.f32 %v1596_v3 }
 0x192   : > { %v703_v48 = vmul.f32 %v1185_v29, %v702_v43  ;;  %771 = vperm.xlu1 %1135, %v733_v44   ;;  %vm724_vm6 = vcmp.eq.f32.partialorder %v723_v41, 8.507059e+37  ;;  %vm707_vm7 = vmor %vm705_vm5, %vm706_vm2  ;;  %v712_v37 = vor.u32 1.1754944e-38, %v711_v53  ;;  %vm710_vm8 = vcmp.eq.f32.partialorder %v709_v55, 8.507059e+37 }
 0x193   : > { %v718_v45 = vadd.f32 %v1183_v27, %v717_v46  ;;  %761 = vperm.xlu2 %1133, %v731_v54   ;;  %v736_v0 = vunpack.c.l.bf16 %v280_v63  ;;  %v738_v4 = vunpack.c.l.bf16 %v283_v49  ;;  %v739_v5 = vunpack.c.h.bf16 %v283_v49 }
 0x194   : > { %v704_v56 = vadd.f32 %v1185_v29, %v703_v48  ;;  %v740_v9 = vunpack.c.l.bf16 %v284_v7  ;;  %v742_v16 = vunpack.c.l.bf16 %v286_v11  ;;  %v737_v17 = vunpack.c.h.bf16 %v280_v63 }
 0x195   : > { %v722_v57 = vsel %vm721_vm4, %v1183_v27, %v718_v45  ;;  %v741_v26 = vunpack.c.h.bf16 %v284_v7  ;;  %v743_v47 = vunpack.c.h.bf16 %v286_v11  ;;  %vm848_vm9 = vcmask 1041409  }
 0x196   : > { %v727_v58 = vsel %vm724_vm6, %v726_v51, %v722_v57  ;;  %v708_v59 = vsel %vm707_vm7, %v1185_v29, %v704_v56  ;;  %vm850_vm10 = vcmask 1042434   ;;  %vm852_vm11 = vcmask 1043459  }
 0x197   : > { %v713_v50 = vsel %vm710_vm8, %v712_v37, %v708_v59  ;;  %v735_v60 = vmul.f32 %v1551_v13, %v727_v58  ;;  %vm854_vm12 = vcmask 1044484   ;;  %vm856_vm13 = vcmask 1045509  }
 0x198   : > { %v734_v52 = vmul.f32 %v1561_v19, %v713_v50  ;;  %vm858_vm14 = vcmask 1046534   ;;  %vm860_vm15 = vcmask 1047559  }
 0x19a   : > { %781 = vperm.xlu1 %1135, %v735_v60  }
 0x19b   : > { %776 = vperm.xlu2 %1133, %v734_v52  }
 0x1dd   : > { %v747_v61 = vpop.permute.xlu2 %746 }
 0x1de   : > { %v784_v3 = vmul.f32 %v747_v61, %v736_v0 }
 0x1e0   : > { %v792_v8 = vrot.slane %v784_v3, 4 }
 0x1e2   : > { %v793_v19 = vadd.f32 %v792_v8, %v784_v3 }
 0x1e4   : > { %v794_v23 = vrot.slane %v793_v19, 2 }
 0x1e5   : > { %v767_v62 = vpop.permute.xlu2 %766 }
 0x1e6   : > { %v788_v15 = vmul.f32 %v767_v62, %v740_v9  ;;  %v795_v30 = vadd.f32 %v794_v23, %v793_v19 }
 0x1e8   : > { %v816_v10 = vrot.slane %v788_v15, 4  ;;  %v796_v41 = vrot.slane %v795_v30, 1 }
 0x1ea   : > { %v817_v31 = vadd.f32 %v816_v10, %v788_v15  ;;  %v797_v45 = vadd.f32 %v796_v41, %v795_v30 }
 0x1ec   : > { %v818_v42 = vrot.slane %v817_v31, 2 }
 0x1ed   : > { %v762_v2 = vpop.permute.xlu2 %761 }
 0x1ee   : > { %v787_v13 = vmul.f32 %v762_v2, %v739_v5  ;;  %v819_v55 = vadd.f32 %v818_v42, %v817_v31 }
 0x1f0   : > { %v810_v18 = vrot.slane %v787_v13, 4  ;;  %v820_v62 = vrot.slane %v819_v55, 1 }
 0x1f2   : > { %v811_v27 = vadd.f32 %v810_v18, %v787_v13  ;;  %v821_v5 = vadd.f32 %v820_v62, %v819_v55 }
 0x1f4   : > { %v812_v35 = vrot.slane %v811_v27, 2 }
 0x1f5   : > { %v777_v20 = vpop.permute.xlu2 %776 }
 0x1f6   : > { %v757_v6 = vpop.permute.xlu1 %756  ;;  %v790_v24 = vmul.f32 %v777_v20, %v742_v16  ;;  %v813_v14 = vadd.f32 %v812_v35, %v811_v27 }
 0x1f7   : > { %v786_v1 = vmul.f32 %v757_v6, %v738_v4 }
 0x1f8   : > { %v828_v32 = vrot.slane %v790_v24, 4  ;;  %v814_v58 = vrot.slane %v813_v14, 1 }
 0x1f9   : > { %v804_v12 = vrot.slane %v786_v1, 4 }
 0x1fa   : > { %v829_v43 = vadd.f32 %v828_v32, %v790_v24  ;;  %v815_v49 = vadd.f32 %v814_v58, %v813_v14 }
 0x1fb   : > { %v805_v21 = vadd.f32 %v804_v12, %v786_v1 }
 0x1fc   : > { %v830_v51 = vrot.slane %v829_v43, 2 }
 0x1fd   : > { %v806_v28 = vrot.slane %v805_v21, 2 }
 0x1fe   : > { %v752_v22 = vpop.permute.xlu0 %751  ;;  %v831_v63 = vadd.f32 %v830_v51, %v829_v43 }
 0x1ff   : > { %v785_v25 = vmul.f32 %v752_v22, %v737_v17  ;;  %v807_v38 = vadd.f32 %v806_v28, %v805_v21 }
 0x200   : > { %v832_v6 = vrot.slane %v831_v63, 1 }
 0x201   : > { %v798_v29 = vrot.slane %v785_v25, 4  ;;  %v808_v48 = vrot.slane %v807_v38, 1 }
 0x202   : > { %v833_v11 = vadd.f32 %v832_v6, %v831_v63 }
 0x203   : > { %v799_v34 = vadd.f32 %v798_v29, %v785_v25  ;;  %v809_v50 = vadd.f32 %v808_v48, %v807_v38 }
 0x204   : > { %v772_v33 = vpop.permute.xlu1 %771 }
 0x205   : > { %v789_v36 = vmul.f32 %v772_v33, %v741_v26  ;;  %v800_v39 = vrot.slane %v799_v34, 2 }
 0x207   : > { %v822_v40 = vrot.slane %v789_v36, 4  ;;  %v801_v44 = vadd.f32 %v800_v39, %v799_v34 }
 0x209   : > { %v823_v46 = vadd.f32 %v822_v40, %v789_v36  ;;  %v802_v53 = vrot.slane %v801_v44, 1 }
 0x20b   : > { %v824_v54 = vrot.slane %v823_v46, 2  ;;  %v803_v56 = vadd.f32 %v802_v53, %v801_v44 }
 0x20c   : > { %v782_v57 = vpop.permute.xlu1 %781 }
 0x20d   : > { %v825_v59 = vadd.f32 %v824_v54, %v823_v46  ;;  %v791_v37 = vmul.f32 %v782_v57, %v743_v47  ;;  %v849_v60 = vsel %vm848_vm9, %v803_v56, %v797_v45 }
 0x20e   : > { %v851_v0 = vsel %vm850_vm10, %v809_v50, %v849_v60 }
 0x20f   : > { %v826_v52 = vrot.slane %v825_v59, 1  ;;  %v834_v61 = vrot.slane %v791_v37, 4  ;;  %v853_v3 = vsel %vm852_vm11, %v815_v49, %v851_v0 }
 0x210   : > { %v855_v8 = vsel %vm854_vm12, %v821_v5, %v853_v3 }
 0x211   : > { %v835_v4 = vadd.f32 %v834_v61, %v791_v37  ;;  %v827_v2 = vadd.f32 %v826_v52, %v825_v59 }
 0x213   : > { %v836_v7 = vrot.slane %v835_v4, 2  ;;  %v857_v9 = vsel %vm856_vm13, %v827_v2, %v855_v8 }
 0x214   : > { %v859_v19 = vsel %vm858_vm14, %v833_v11, %v857_v9 }
 0x215   : > { %v837_v1 = vadd.f32 %v836_v7, %v835_v4 }
 0x217   : > { %v838_v13 = vrot.slane %v837_v1, 1 }
 0x219   : > { %v839_v12 = vadd.f32 %v838_v13, %v837_v1 }
 0x21b   : > { %v861_v15 = vsel %vm860_vm15, %v839_v12, %v859_v19 }
 0x21c   : > { %863 = vst [vmem:[%s274_s15] sm:$0xff] %v861_v15 }
 0x21d   : > { %1273 = shalt.err (!%p1270_p12)
}
 0x21e   : > { %1079 = dma.vmem_to_hbm [thread:$0]  (%p1421_p3), %s878_s22, 128, %s880_s24, %s865_s29  }
 0x21f PF: > { %s891_s28 = sand.u32 1, %s1304_s18   ;;  %p1694_p13 = scmp.ge.s32.totalorder %s1316_s21, 2 }
 0x220   : > { %s892_s23 = scalar_lea.sflag [#allocation4], %s891_s28 }
 0x221   : > { %p1090_p0 = pnand %p1694_p13, %p1387_p6 }
 0x223   : > { %p1091_p5 = pneg %p1090_p0 }
 0x225   : > { %1299 = dma.done.wait (%p1091_p5), %s892_s23, 128  }
 0x226   : > { %1301 = vsyncadd (%p1091_p5), %s892_s23, 4294967168  ;;  %p19_p7 = scmp.ge.s32.totalorder %s1405_s7, 4   ;;  %s1695_s18 = smov %s1308_s19 }
 0x227   : > { %s1696_s19 = smov %s1312_s20  ;;  %s1697_s20 = smov %s1417_s12 }
 0x228   : > { %s1698_s21 = smov %s1405_s7  ;;  %21 = sbr.rel (!%p19_p7) target bundleno = 6 (0x6), region = 92 }
 0x22d   :  { %898 = vsyncpa [#allocation3], 1 }
 0x22e   :  { %900 = vsyncpa [#allocation3 + $0x1], 1 }
 0x22f   :  { %901 = vsyncpa [#allocation6], 1 }
 0x230   :  { %902 = vsyncpa [#allocation4], 1 }
 0x231   :  { %904 = vsyncpa [#allocation4 + $0x1], 1 }

</bundles_post_ra>
